<compile_context>
chip_gen: v6e
topology: v6e:2x2x1
jax: 0.10.0
libtpu: 0.0.40
codegen_flags: <defaults>
</compile_context>

<pallas_src>
import functools

import jax
import jax.numpy as jnp
from jax.experimental import pallas as pl
from jax.experimental.pallas import tpu as pltpu


def _round_up(x, m):
    return (x + m - 1) // m * m


def _vmem_capacity_bytes():
    """Per-TensorCore VMEM capacity; conservative 64 MiB fallback (v7x floor)."""
    try:
        info = pltpu.get_tpu_info()
        cap = getattr(info, "vmem_capacity_bytes", None)
        if cap:
            return int(cap)
    except Exception:
        pass
    return 64 << 20


def _single_buffer_kwargs():
    """pipeline_mode=pl.Buffered(1) for grid-invariant operands, hedged for older jax."""
    if not hasattr(pl, "Buffered"):
        return {}
    try:
        pl.BlockSpec((1, 1), lambda i: (0, 0), pipeline_mode=pl.Buffered(1))
    except TypeError:
        return {}
    return {"pipeline_mode": pl.Buffered(1)}


def _attention_kernel(x_ref, w_ref, bw_ref, vrow_ref, bv_ref, o_ref, *, seq_valid):
    # x_ref:    (B_blk, S_pad, D_pad)  features block (VMEM), lane-dense (D_pad % 128 == 0)
    # w_ref:    (D_pad, H)             W weight (pre-transposed, features dtype)
    # bw_ref:   (1, H)                 W bias (f32)
    # vrow_ref: (1, H)                 V weight as a row (output_dim == 1, f32)
    # bv_ref:   (1,)                   V bias (SMEM scalar)
    # o_ref:    (B_blk, S_pad, D_pad)  context output block
    b_blk, s, d = x_ref.shape

    x = x_ref[...]                                  # (B_blk, S, D)
    x2 = x.reshape(b_blk * s, d)                    # S % 8 == 0 -> tile-aligned leading merge

    # energy = tanh(x @ W + bW): MXU matmul in the input dtype, f32 accumulate, EUP tanh.
    energy = jnp.tanh(
        jnp.dot(x2, w_ref[...], preferred_element_type=jnp.float32) + bw_ref[...]
    )                                               # (B_blk*S, H) f32

    # scores = energy @ V + bV with output_dim == 1: VPU multiply + lane reduction
    # instead of a 1-wide MXU matmul.
    scores = jnp.sum(energy * vrow_ref[...], axis=-1, keepdims=True) + bv_ref[0]
    scores = scores.reshape(b_blk, s, 1)            # (B_blk, S, 1)

    if seq_valid < s:                               # static: mask wrapper-padded seq rows
        seq_idx = jax.lax.broadcasted_iota(jnp.int32, (1, s, 1), 1)
        scores = jnp.where(seq_idx < seq_valid, scores, -jnp.inf)

    # softmax over the sequence axis (PyTorch dim=1); denominator via EUP approx reciprocal.
    m = jnp.max(scores, axis=1, keepdims=True)
    e = jnp.exp(scores - m)
    attn = e * pl.reciprocal(jnp.sum(e, axis=1, keepdims=True), approx=True)

    # context = attention * features (broadcast over the feature dim)
    o_ref[...] = (attn * x).astype(o_ref.dtype)


def attention_forward(features, w, bw, v, bv, *, vmem_fraction=0.45):
    """features: (B, S, D). w: (D, H), bw: (H,), v: (H, 1), bv: (1,)."""
    B, S, D = features.shape
    D2, H = w.shape
    assert D2 == D
    assert v.shape[1] == 1, "attention * features broadcast requires output_dim == 1"

    compute_dtype = features.dtype
    itemsize = jnp.dtype(compute_dtype).itemsize

    # Lane/sublane alignment: D -> multiple of 128 (lane-dense, unmasked stores),
    # S -> multiple of 8 (tile-aligned reshape in the kernel).  Zero padding is exact:
    # padded feature columns flow through zero-padded W rows and a zero multiply on the
    # output; padded seq positions are masked to -inf before the softmax.
    d_pad = _round_up(D, 128)
    s_pad = _round_up(S, 8)
    x = features
    if d_pad != D or s_pad != S:
        x = jnp.pad(x, ((0, 0), (0, s_pad - S), (0, d_pad - D)))
    w_p = w.astype(compute_dtype)                   # no force-upcast; bf16 stays bf16
    if d_pad != D:
        w_p = jnp.pad(w_p, ((0, d_pad - D), (0, 0)))

    w_bias = bw.reshape(1, H).astype(jnp.float32)
    v_row = v.reshape(1, H).astype(jnp.float32)     # (H, 1) -> (1, H) since output_dim == 1
    v_bias = bv.reshape(1).astype(jnp.float32)

    # ---- generation-aware block sizing --------------------------------------------------
    vmem_cap = _vmem_capacity_bytes()
    weight_bytes = d_pad * H * itemsize + 2 * H * 4 + 128
    # Per batch row: in+out feature blocks double-buffered, f32 energy temp, f32 context temp.
    per_row = s_pad * (4 * d_pad * itemsize + H * 4 + d_pad * 4)
    budget = int(vmem_fraction * vmem_cap) - 2 * weight_bytes
    if budget <= 0 or per_row > budget:
        # TODO(synk): S-tiled online-softmax path for sequences whose single (S, D) plane
        # exceeds the per-TensorCore VMEM tile budget (needed for very long S on v7x).
        raise ValueError(
            f"one (S={s_pad}, D={d_pad}) plane needs {per_row} bytes of VMEM tiles but the "
            f"budget is {budget} bytes; S-tiled online softmax not implemented")
    b_blk = int(max(1, min(B, budget // per_row)))
    grid = (pl.cdiv(B, b_blk),)                     # ragged last block: Pallas masks writes

    need = b_blk * per_row + 2 * weight_bytes
    vmem_limit = int(min(max(int(need * 1.3), 16 << 20), int(0.62 * vmem_cap)))
    vmem_limit = max(vmem_limit, need + (1 << 20))  # never declare less than we use

    cost = pl.CostEstimate(
        flops=2 * B * s_pad * d_pad * H + 4 * B * s_pad * H + 6 * B * s_pad * d_pad,
        transcendentals=B * s_pad * H + B * s_pad,
        bytes_accessed=2 * B * s_pad * d_pad * itemsize + weight_bytes,
    )

    const = _single_buffer_kwargs()

    out = pl.pallas_call(
        functools.partial(_attention_kernel, seq_valid=S),
        out_shape=jax.ShapeDtypeStruct((B, s_pad, d_pad), features.dtype),
        grid_spec=pltpu.PrefetchScalarGridSpec(
            num_scalar_prefetch=0,
            grid=grid,
            in_specs=[
                pl.BlockSpec((b_blk, s_pad, d_pad), lambda b: (b, 0, 0)),   # features block
                pl.BlockSpec((d_pad, H), lambda b: (0, 0), **const),        # W (grid-invariant)
                pl.BlockSpec((1, H), lambda b: (0, 0), **const),            # bW
                pl.BlockSpec((1, H), lambda b: (0, 0), **const),            # V as a row
                pl.BlockSpec(memory_space=pltpu.MemorySpace.SMEM),          # bV scalar
            ],
            out_specs=pl.BlockSpec((b_blk, s_pad, d_pad), lambda b: (b, 0, 0)),
        ),
        compiler_params=pltpu.CompilerParams(
            # TODO(synk): verify on v7x whether pltpu.CORE_PARALLEL is required to shard the
            # batch axis over its 2 TensorCores; PARALLEL kept as the portable choice.
            dimension_semantics=(pltpu.PARALLEL,),
            vmem_limit_bytes=vmem_limit,
        ),
        cost_estimate=cost,
    )(x, w_p, w_bias, v_row, v_bias)

    if d_pad != D or s_pad != S:
        out = out[:, :S, :D]
    return out


def attention_ref(features, w, bw, v, bv):
    energy = jnp.tanh(features @ w + bw)            # (B, S, H)
    scores = energy @ v + bv                        # (B, S, 1)
    attn = jax.nn.softmax(scores, axis=1)           # softmax over seq (dim=1)
    return attn * features


if __name__ == "__main__":
    # Small shapes consistent with the module: output_dim = 1 so the broadcast
    # `attention * features` matches PyTorch semantics.
    B, S = 2, 8
    input_dim, hidden_dim, output_dim = 32, 32, 1

    key = jax.random.PRNGKey(0)
    kx, kw, kbw, kv, kbv = jax.random.split(key, 5)

    features = jax.random.normal(kx, (B, S, input_dim), dtype=jnp.float32)

    # Deterministic parameter init (PyTorch-Linear-style uniform bounds).
    bound_w = 1.0 / (input_dim ** 0.5)
    bound_v = 1.0 / (hidden_dim ** 0.5)
    w = jax.random.uniform(kw, (input_dim, hidden_dim), jnp.float32, -bound_w, bound_w)
    bw = jax.random.uniform(kbw, (hidden_dim,), jnp.float32, -bound_w, bound_w)
    v = jax.random.uniform(kv, (hidden_dim, output_dim), jnp.float32, -bound_v, bound_v)
    bv = jax.random.uniform(kbv, (output_dim,), jnp.float32, -bound_v, bound_v)

    out = attention_forward(features, w, bw, v, bv)
    out = jax.block_until_ready(out)

    ref = attention_ref(features, w, bw, v, bv)
    assert out.shape == (B, S, input_dim)
    # Tolerance accounts for the EUP approximate reciprocal in the softmax denominator
    # (relative error ~1e-4).
    assert jnp.allclose(out, ref, atol=1e-3, rtol=1e-3), "mismatch vs pure-JAX reference"

    print("KERNEL_OK")
</pallas_src>

<mosaic_0001>
module attributes {stable_mosaic.version = 11 : i64} {
  func.func @_attention_kernel(%arg0: i32, %arg1: memref<2x8x128xf32, #tpu.memory_space<vmem>>, %arg2: memref<128x32xf32, #tpu.memory_space<vmem>>, %arg3: memref<1x32xf32, #tpu.memory_space<vmem>>, %arg4: memref<1x32xf32, #tpu.memory_space<vmem>>, %arg5: memref<1xf32, #tpu.memory_space<smem>>, %arg6: memref<2x8x128xf32, #tpu.memory_space<vmem>>) attributes {dimension_semantics = [#tpu.dimension_semantics<parallel>], iteration_bounds = array<i64: 1>, scalar_prefetch = 0 : i64, scratch_operands = 0 : i64, tpu.core_type = #tpu.core_type<tc>, window_params = [{transform_indices = @transform_0, window_bounds = array<i64: 2, 8, 128>}, {pipeline_mode = #tpu.pipeline_mode<synchronous>, transform_indices = @transform_1, window_bounds = array<i64: 128, 32>}, {pipeline_mode = #tpu.pipeline_mode<synchronous>, transform_indices = @transform_2, window_bounds = array<i64: 1, 32>}, {pipeline_mode = #tpu.pipeline_mode<synchronous>, transform_indices = @transform_3, window_bounds = array<i64: 1, 32>}, {transform_indices = @transform_4, window_bounds = array<i64: 1>}, {transform_indices = @transform_5, window_bounds = array<i64: 2, 8, 128>}]} {
    %c0 = arith.constant 0 : index
    %c0_0 = arith.constant 0 : index
    %c0_1 = arith.constant 0 : index
    %0 = vector.load %arg1[%c0, %c0_0, %c0_1] : memref<2x8x128xf32, #tpu.memory_space<vmem>>, vector<2x8x128xf32>
    %1 = vector.shape_cast %0 : vector<2x8x128xf32> to vector<16x128xf32>
    %c0_2 = arith.constant 0 : index
    %c0_3 = arith.constant 0 : index
    %2 = vector.load %arg2[%c0_2, %c0_3] : memref<128x32xf32, #tpu.memory_space<vmem>>, vector<128x32xf32>
    %cst = arith.constant dense<0.000000e+00> : vector<16x32xf32>
    %3 = tpu.matmul %1, %2, %cst {dimension_numbers = #tpu.dot_dimension_numbers<[1], [0], [0], [1], [0, 0, 1, 1], [], []>} : vector<16x128xf32>, vector<128x32xf32>, vector<16x32xf32> -> vector<16x32xf32>
    %c0_4 = arith.constant 0 : index
    %c0_5 = arith.constant 0 : index
    %4 = vector.load %arg3[%c0_4, %c0_5] : memref<1x32xf32, #tpu.memory_space<vmem>>, vector<1x32xf32>
    %5 = vector.broadcast %4 : vector<1x32xf32> to vector<16x32xf32>
    %6 = arith.addf %3, %5 : vector<16x32xf32>
    %7 = math.tanh %6 : vector<16x32xf32>
    %c0_6 = arith.constant 0 : index
    %c0_7 = arith.constant 0 : index
    %8 = vector.load %arg4[%c0_6, %c0_7] : memref<1x32xf32, #tpu.memory_space<vmem>>, vector<1x32xf32>
    %9 = vector.broadcast %8 : vector<1x32xf32> to vector<16x32xf32>
    %10 = arith.mulf %7, %9 : vector<16x32xf32>
    %cst_8 = arith.constant dense<0.000000e+00> : vector<16xf32>
    %11 = vector.multi_reduction <add>, %10, %cst_8 [1] : vector<16x32xf32> to vector<16xf32>
    %12 = vector.shape_cast %11 : vector<16xf32> to vector<16x1xf32>
    %c0_9 = arith.constant 0 : index
    %13 = memref.load %arg5[%c0_9] : memref<1xf32, #tpu.memory_space<smem>>
    %14 = vector.broadcast %13 : f32 to vector<16x1xf32>
    %15 = arith.addf %12, %14 : vector<16x1xf32>
    %16 = vector.shape_cast %15 : vector<16x1xf32> to vector<2x8x1xf32>
    %cst_10 = arith.constant dense<0xFF800000> : vector<2x1xf32>
    %17 = vector.multi_reduction <maximumf>, %16, %cst_10 [1] : vector<2x8x1xf32> to vector<2x1xf32>
    %18 = vector.shape_cast %17 : vector<2x1xf32> to vector<2x1x1xf32>
    %19 = vector.broadcast %18 : vector<2x1x1xf32> to vector<2x8x1xf32>
    %20 = arith.subf %16, %19 : vector<2x8x1xf32>
    %21 = math.exp %20 : vector<2x8x1xf32>
    %cst_11 = arith.constant dense<0.000000e+00> : vector<2x1xf32>
    %22 = vector.multi_reduction <add>, %21, %cst_11 [1] : vector<2x8x1xf32> to vector<2x1xf32>
    %23 = vector.shape_cast %22 : vector<2x1xf32> to vector<2x1x1xf32>
    %24 = tpu.reciprocal %23 {approx = true} : vector<2x1x1xf32> -> vector<2x1x1xf32>
    %25 = vector.broadcast %24 : vector<2x1x1xf32> to vector<2x8x1xf32>
    %26 = arith.mulf %21, %25 : vector<2x8x1xf32>
    %27 = vector.broadcast %26 : vector<2x8x1xf32> to vector<2x8x128xf32>
    %28 = arith.mulf %27, %0 : vector<2x8x128xf32>
    %c0_12 = arith.constant 0 : index
    %c0_13 = arith.constant 0 : index
    %c0_14 = arith.constant 0 : index
    %29 = vector.load %arg6[%c0_12, %c0_13, %c0_14] : memref<2x8x128xf32, #tpu.memory_space<vmem>>, vector<2x8x128xf32>
    tpu.vector_store %arg6[%c0_12, %c0_13, %c0_14], %28 {strides = array<i32>} : memref<2x8x128xf32, #tpu.memory_space<vmem>>, vector<2x8x128xf32>,
    return
  }
  func.func @transform_0(%arg0: i32) -> (i32, i32, i32) {
    %c0_i32 = arith.constant 0 : i32
    %c0_i32_0 = arith.constant 0 : i32
    %c0_i32_1 = arith.constant 0 : i32
    return %arg0, %c0_i32, %c0_i32_0 : i32, i32, i32
  }
  func.func @transform_1(%arg0: i32) -> (i32, i32) {
    %c0_i32 = arith.constant 0 : i32
    %c0_i32_0 = arith.constant 0 : i32
    %c0_i32_1 = arith.constant 0 : i32
    return %c0_i32, %c0_i32_0 : i32, i32
  }
  func.func @transform_2(%arg0: i32) -> (i32, i32) {
    %c0_i32 = arith.constant 0 : i32
    %c0_i32_0 = arith.constant 0 : i32
    %c0_i32_1 = arith.constant 0 : i32
    return %c0_i32, %c0_i32_0 : i32, i32
  }
  func.func @transform_3(%arg0: i32) -> (i32, i32) {
    %c0_i32 = arith.constant 0 : i32
    %c0_i32_0 = arith.constant 0 : i32
    %c0_i32_1 = arith.constant 0 : i32
    return %c0_i32, %c0_i32_0 : i32, i32
  }
  func.func @transform_4(%arg0: i32) -> i32 {
    %c0_i32 = arith.constant 0 : i32
    %c0_i32_0 = arith.constant 0 : i32
    return %c0_i32 : i32
  }
  func.func @transform_5(%arg0: i32) -> (i32, i32, i32) {
    %c0_i32 = arith.constant 0 : i32
    %c0_i32_0 = arith.constant 0 : i32
    %c0_i32_1 = arith.constant 0 : i32
    return %arg0, %c0_i32, %c0_i32_0 : i32, i32, i32
  }
}

</mosaic_0001>

<bundles_post_ra>
// kernel: tpu_custom_call.1
= control target key start
LH: loop header
LB: loop body
LE: loop exit
PB: predicated region body
PF: predicated region fallthrough
CT: control target
= control target key end

     0   :  { %s397_s0 = inlined_call_operand.vmem [shape: f32[2,8,128], index: 0, kind: input, shape index: {}]   ;;  %s398_s1 = inlined_call_operand.vmem [shape: f32[128,32], index: 1, kind: input, shape index: {}]   ;;  %s399_s2 = inlined_call_operand.vmem [shape: f32[1,32], index: 2, kind: input, shape index: {}]   ;;  %s400_s3 = inlined_call_operand.vmem [shape: f32[1,32], index: 3, kind: input, shape index: {}]   ;;  %s401_s4 = inlined_call_operand.<no memory space> [shape: f32[1], index: 4, kind: input, shape index: {}]   ;;  %s402_s5 = inlined_call_operand.hbm [shape: f32[2,8,128], index: 5, kind: output, shape index: {}]  }
   0x1   :  { %v39_v0 = vld [vmem:[%s398_s1 + $0x78] sm:$0xff]  ;;  %v38_v1 = vld [vmem:[%s398_s1 + $0x70] sm:$0xff]  ;;  %v37_v2 = vld [vmem:[%s398_s1 + $0x68] sm:$0xff] }
   0x2   :  { %218 = vmatprep.subr.mxu0 %v39_v0  ;;  %v36_v3 = vld [vmem:[%s398_s1 + $0x60] sm:$0xff]  ;;  %v35_v5 = vld [vmem:[%s398_s1 + $0x58] sm:$0xff] }
   0x3   :  { %219 = vmatpush3.msra.mxu0 %v39_v0  ;;  %v338_v4 = vld [vmem:[%s397_s0] sm:$0xff] }
   0x4   :  { %220 = vmatprep.subr.mxu0 %v38_v1  ;;  %250 = vmatprep.mubr.f32.mxu0 %v338_v4 }
   0x5   :  { %221 = vmatpush3.msra.mxu0 %v38_v1 }
   0x6   :  { %222 = vmatprep.subr.mxu0 %v37_v2 }
   0x7   :  { %223 = vmatpush3.msra.mxu0 %v37_v2 }
   0x8   :  { %11 = vsyncpa [#allocation4], 0  ;;  %224 = vmatprep.subr.mxu0 %v36_v3  ;;  %v34_v6 = vld [vmem:[%s398_s1 + $0x50] sm:$0xff]  ;;  %v33_v7 = vld [vmem:[%s398_s1 + $0x48] sm:$0xff]  ;;  %vm133_vm0 = vcmask 261120   ;;  %v141_v30 = vstv %s401_s4 }
   0x9   :  { %225 = vmatpush3.msra.mxu0 %v36_v3  ;;  %v32_v8 = vld [vmem:[%s398_s1 + $0x40] sm:$0xff]  ;;  %v31_v9 = vld [vmem:[%s398_s1 + $0x38] sm:$0xff]  ;;  %v30_v10 = vld [vmem:[%s398_s1 + $0x30] sm:$0xff] }
   0xa   :  { %226 = vmatprep.subr.mxu0 %v35_v5  ;;  %v29_v11 = vld [vmem:[%s398_s1 + $0x28] sm:$0xff]  ;;  %v28_v12 = vld [vmem:[%s398_s1 + $0x20] sm:$0xff]  ;;  %v27_v13 = vld [vmem:[%s398_s1 + $0x18] sm:$0xff] }
   0xb   :  { %227 = vmatpush3.msra.mxu0 %v35_v5  ;;  %v26_v14 = vld [vmem:[%s398_s1 + $0x10] sm:$0xff]  ;;  %v25_v15 = vld [vmem:[%s398_s1 + $0x8] sm:$0xff]  ;;  %v24_v16 = vld [vmem:[%s398_s1] sm:$0xff] }
   0xc   :  { %228 = vmatprep.subr.mxu0 %v34_v6  ;;  %v380_v17 = vld [vmem:[%s397_s0 + $0x8] sm:$0xff]  ;;  %v198_v18 = vld [vmem:[%s399_s2] ss:$0 sm:$0xff] }
   0xd   :  { %229 = vmatpush3.msra.mxu0 %v34_v6  ;;  %v199_v25 = vld [vmem:[%s400_s3] ss:$0 sm:$0xff]  ;;  %s290_s3 = smov [#allocation3]  }
   0xe   :  { %230 = vmatprep.subr.mxu0 %v33_v7  ;;  %s187_s4 = sshll.u32 %s290_s3, 4  ;;  %s188_s4 = int_to_ptr.vmem [resolvable:$true] %s187_s4 }
   0xf   :  { %231 = vmatpush3.msra.mxu0 %v33_v7  ;;  %s268_s7 = scalar_lea.vmem %s188_s4, 256  ;;  %p273_p1 = scmp.lt.s32.totalorder %s188_s4, %s188_s4 }
  0x10   :  { %232 = vmatprep.subr.mxu0 %v32_v8  ;;  %p269_p0 = scmp.ne.s32.totalorder %s188_s4, %s268_s7  ;;  %p274_p2 = scmp.lt.s32.totalorder %s268_s7, %s268_s7 }
  0x11   :  { %233 = vmatpush3.msra.mxu0 %v32_v8 }
  0x12   :  { %234 = vmatprep.subr.mxu0 %v31_v9  ;;  %p275_p3 = por %p274_p2, %p273_p1 }
  0x13   :  { %235 = vmatpush3.msra.mxu0 %v31_v9 }
  0x14   :  { %236 = vmatprep.subr.mxu0 %v30_v10  ;;  %p276_p4 = pnand %p275_p3, %p269_p0 }
  0x15   :  { %237 = vmatpush3.msra.mxu0 %v30_v10 }
  0x16   :  { %238 = vmatprep.subr.mxu0 %v29_v11 }
  0x17   :  { %239 = vmatpush3.msra.mxu0 %v29_v11 }
  0x18   :  { %240 = vmatprep.subr.mxu0 %v28_v12 }
  0x19   :  { %241 = vmatpush3.msra.mxu0 %v28_v12 }
  0x1a   :  { %242 = vmatprep.subr.mxu0 %v27_v13 }
  0x1b   :  { %243 = vmatpush3.msra.mxu0 %v27_v13 }
  0x1c   :  { %244 = vmatprep.subr.mxu0 %v26_v14 }
  0x1d   :  { %245 = vmatpush3.msra.mxu0 %v26_v14 }
  0x1e   :  { %246 = vmatprep.subr.mxu0 %v25_v15 }
  0x1f   :  { %247 = vmatpush3.msra.mxu0 %v25_v15 }
  0x20   :  { %248 = vmatprep.subr.mxu0 %v24_v16 }
  0x21   :  { %249 = vmatpush3.msra.mxu0 %v24_v16 }
  0x22   :  { %251 = vmatmul.mubr.f32.vlgmr.msra.gmra.mxu0 %v380_v17 }
  0xe2   :  { %v252_v19 = vpop.f32.mrf.mxu0 }
  0xe3   :  { %v119_v20 = vadd.f32 %v252_v19, %v198_v18 }
  0xe4   :  { %v113_v21 = vpop.f32.mrf.mxu0 }
  0xe5   :  { %v114_v22 = vadd.f32 %v198_v18, %v113_v21  ;;  %256 = vtanh.f32 %v119_v20 }
  0xe7   :  { %258 = vtanh.f32 %v114_v22 }
  0xf2   :  { %v257_v23 = vpop.eup %256 }
  0xf3   :  { %v132_v28 = vmul.f32 %v257_v23, %v199_v25 }
  0xf4   :  { %v259_v24 = vpop.eup %258 }
  0xf5   :  { %v131_v26 = vmul.f32 %v259_v24, %v199_v25  ;;  %v137_v29 = vsel %vm133_vm0, %v132_v28, 0.0 }
  0xf7   :  { %v134_v27 = vsel %vm133_vm0, %v131_v26, 0.0 }
  0xf8   :  { %135 = vadd.xlane.f32.xlu0 %v134_v27 }
  0xfc   :  { %138 = vadd.xlane.f32.xlu0 %v137_v29 }
 0x181   :  { %v136_v31 = vpop.xlane.xlu0 %135 }
 0x182   :  { %v142_v32 = vadd.f32 %v141_v30, %v136_v31 }
 0x184   :  { %v144_v33 = vrot.slane %v142_v32, 4 }
 0x185   :  { %v139_v34 = vpop.xlane.xlu0 %138 }
 0x186   :  { %v145_v35 = vmax.f32 %v142_v32, %v144_v33  ;;  %v143_v36 = vadd.f32 %v141_v30, %v139_v34 }
 0x188   :  { %v146_v37 = vrot.slane %v145_v35, 2  ;;  %v150_v38 = vrot.slane %v143_v36, 4 }
 0x18a   :  { %v147_v39 = vmax.f32 %v145_v35, %v146_v37  ;;  %v151_v40 = vmax.f32 %v143_v36, %v150_v38 }
 0x18c   :  { %v148_v41 = vrot.slane %v147_v39, 1  ;;  %v152_v42 = vrot.slane %v151_v40, 2 }
 0x18e   :  { %v149_v43 = vmax.f32 %v147_v39, %v148_v41  ;;  %v153_v44 = vmax.f32 %v151_v40, %v152_v42 }
 0x190   :  { %v156_v45 = vsub.f32 %v142_v32, %v149_v43  ;;  %v154_v46 = vrot.slane %v153_v44, 1 }
 0x192   :  { %v158_v47 = vmul.f32 1.442695, %v156_v45  ;;  %v155_v48 = vmax.f32 %v153_v44, %v154_v46 }
 0x194   :  { %260 = vpow2.f32 %v158_v47  ;;  %v157_v49 = vsub.f32 %v143_v36, %v155_v48 }
 0x196   :  { %v160_v50 = vmul.f32 1.442695, %v157_v49 }
 0x198   :  { %262 = vpow2.f32 %v160_v50 }
 0x1a1   :  { %v261_v51 = vpop.eup %260 }
 0x1a2   :  { %v162_v52 = vrot.slane %v261_v51, 4 }
 0x1a4   :  { %v163_v53 = vadd.f32 %v261_v51, %v162_v52 }
 0x1a5   :  { %v263_v54 = vpop.eup %262 }
 0x1a6   :  { %v164_v55 = vrot.slane %v163_v53, 2  ;;  %v168_v56 = vrot.slane %v263_v54, 4 }
 0x1a8   :  { %v165_v57 = vadd.f32 %v164_v55, %v163_v53  ;;  %v169_v58 = vadd.f32 %v263_v54, %v168_v56 }
 0x1aa   :  { %v166_v59 = vrot.slane %v165_v57, 1  ;;  %v170_v60 = vrot.slane %v169_v58, 2 }
 0x1ac   :  { %v167_v61 = vadd.f32 %v166_v59, %v165_v57  ;;  %v171_v62 = vadd.f32 %v170_v60, %v169_v58 }
 0x1ae   :  { %v172_v63 = vrot.slane %v171_v62, 1  ;;  %264 = vrcp.f32 %v167_v61 }
 0x1b0   :  { %v173_v0 = vadd.f32 %v172_v63, %v171_v62 }
 0x1b2   :  { %266 = vrcp.f32 %v173_v0 }
 0x1bb   :  { %v265_v1 = vpop.eup %264 }
 0x1bc   :  { %v176_v2 = vmul.f32 %v265_v1, %v261_v51 }
 0x1be   :  { %v178_v3 = vmul.f32 %v176_v2, %v338_v4 }
 0x1bf   :  { %v267_v5 = vpop.eup %266 }
 0x1c0   :  { %v177_v6 = vmul.f32 %v267_v5, %v263_v54  ;;  %180 = vst [vmem:[#allocation3] sm:$0xff] %v178_v3 }
 0x1c2   :  { %v179_v7 = vmul.f32 %v177_v6, %v380_v17 }
 0x1c4   :  { %181 = vst [vmem:[#allocation3 + $0x8] sm:$0xff] %v179_v7 }
 0x1c5   :  { %279 = shalt.err (!%p276_p4)
}
 0x1c6   :  { %s291_s8 = smov 128   ;;  %s292_s9 = smov 8  }
 0x1c7   :  { %193 = dma.vmem_to_hbm [thread:$0]  %s188_s4, 256, %s402_s5, [#allocation4], %s291_s8, %s291_s8, %s292_s9  }
 0x1c8   :  { %288 = dma.done.wait [#allocation4], 256  }
 0x1c9   :  { %289 = vsyncadd [#allocation4], 4294967040 }
 0x1ca   :  { %197 = vsyncpa [#allocation4], 1 }

</bundles_post_ra>
